<compile_context>
chip_gen: v7x
topology: tpu7x:2x2x1
jax: 0.10.0
libtpu: 0.0.40
codegen_flags: <defaults>
</compile_context>

<pallas_src>
import jax
import jax.numpy as jnp
import numpy as np
from jax import lax
from jax.experimental import pallas as pl
from jax.experimental.pallas import tpu as pltpu

NUM_CLASSES = 10
TAU = 3.0
BETA = 1.0
NEG_INF = -1e30            # python float -> lowers as a literal
DEFAULT_TILE_N = 32768     # batch (lane) tile; ~4 MiB of f32 inputs per step


def _ntd_loss_kernel(n_ref, tgt_ref, shallow_ref, logits_ref, dg_ref,
                     out_ref, acc_ref):
    """One batch tile.  Layout: class axis on sublanes, batch on lanes."""
    step = pl.program_id(0)

    @pl.when(step == 0)
    def _init():
        acc_ref[...] = jnp.zeros_like(acc_ref)

    shallow = shallow_ref[...].astype(jnp.float32)   # [C, T]
    logits = logits_ref[...].astype(jnp.float32)     # [C, T]
    dg = dg_ref[...].astype(jnp.float32)             # [C, T]
    tgt = tgt_ref[...]                               # [1, T] int32

    c, t = logits.shape
    cls = lax.broadcasted_iota(jnp.int32, (c, t), 0)          # class id per sublane
    true_mask = cls == tgt                                    # [C, T] one-hot
    nt_mask = jnp.logical_not(true_mask)                      # "not-true" positions

    # Columns that are real (non-padded) batch samples.
    n_valid = n_ref[0]
    col = lax.broadcasted_iota(jnp.int32, (1, t), 1) + step * t
    valid = col < n_valid                                     # [1, T]

    # ---------------- cross-entropy over all classes (per column) -----------
    m = jnp.max(logits, axis=0, keepdims=True)                                 # [1,T]
    lse = m + jnp.log(jnp.sum(jnp.exp(logits - m), axis=0, keepdims=True))     # [1,T]
    true_logit = jnp.sum(jnp.where(true_mask, logits, 0.0), axis=0, keepdims=True)
    ce = lse - true_logit                                                      # [1,T]

    # -------- not-true softmax statistics at temperature tau ----------------
    inv_tau = 1.0 / TAU

    def nt_stats(x):
        xs = x * inv_tau
        mm = jnp.max(jnp.where(nt_mask, xs, NEG_INF), axis=0, keepdims=True)
        e = jnp.exp(jnp.where(nt_mask, xs - mm, NEG_INF))     # exactly 0 on true row
        ssum = jnp.sum(e, axis=0, keepdims=True)
        lse_nt = mm + jnp.log(ssum)                           # [1,T]
        return xs, e, ssum, lse_nt

    xs_lg, _, _, L_lg = nt_stats(logits)        # student
    xs_sh, _, _, L_sh = nt_stats(shallow)       # shallow
    xs_dg, e_dg, ssum_dg, L_dg = nt_stats(dg)   # global (teacher)

    # Teacher probabilities reuse the exponentials already computed above.
    p = e_dg * pl.reciprocal(ssum_dg)           # [C,T]; 0 on the true row

    # With sum_c p_c = 1 on valid columns:
    #   KL(p || q) = sum_c p_c * (xs_p - xs_q) - L_p + L_q
    # so only the three dot products + per-column lse's are needed; the full
    # student/shallow log-softmax tensors are never materialized.
    dot_dg = jnp.sum(p * xs_dg, axis=0, keepdims=True)
    dot_lg = jnp.sum(p * xs_lg, axis=0, keepdims=True)
    dot_sh = jnp.sum(p * xs_sh, axis=0, keepdims=True)

    kl_shared = dot_dg - L_dg
    kl_main = kl_shared - dot_lg + L_lg          # KL(teacher || student)
    kl_sd = kl_shared - dot_sh + L_sh            # KL(teacher || shallow)

    # Per-column combined loss (constant scalings folded in), padded cols -> 0.
    combined = ce + (BETA * TAU * TAU) * kl_main + 2.0 * kl_sd
    combined = jnp.where(valid, combined, 0.0)

    # Per-lane VMEM accumulation only (no cross-lane reduce, no SMEM RMW here).
    acc_ref[...] = acc_ref[...] + combined

    @pl.when(step == pl.num_programs(0) - 1)
    def _finalize():
        out_ref[0, 0] = jnp.sum(acc_ref[...]) / n_valid.astype(jnp.float32)


def ntd_loss(shallow_logits, logits, targets, dg_logits, *, tile_n=DEFAULT_TILE_N):
    """Pallas implementation of NTD_Loss.forward.  Returns a scalar f32."""
    n, c = logits.shape
    # Lane-dense layout: batch on the last (lane) axis, padded to the tile.
    tile = max(128, min(int(tile_n), pl.cdiv(n, 128) * 128))
    n_pad = pl.cdiv(n, tile) * tile
    grid = (n_pad // tile,)

    def prep(x):
        # Keep native dtype (bf16 inputs halve DMA bytes); cast to f32 on-chip.
        x = jnp.asarray(x).T                      # [C, N]
        return jnp.pad(x, ((0, 0), (0, n_pad - n)))

    tgt = jnp.pad(jnp.asarray(targets, jnp.int32).reshape(1, n),
                  ((0, 0), (0, n_pad - n)))
    n_arr = jnp.asarray([n], dtype=jnp.int32)

    itemsize = jnp.dtype(logits.dtype).itemsize
    block_bytes = 3 * c * tile * itemsize + 4 * tile        # one buffer set
    # Safe on every generation (v7x physical VMEM is 64 MiB), generous on all.
    vmem_limit = int(min(48 << 20, max(32 << 20, 4 * block_bytes)))

    grid_spec = pltpu.PrefetchScalarGridSpec(
        num_scalar_prefetch=1,
        grid=grid,
        in_specs=[
            pl.BlockSpec((1, tile), lambda i, n_ref: (0, i)),   # targets
            pl.BlockSpec((c, tile), lambda i, n_ref: (0, i)),   # shallow logits
            pl.BlockSpec((c, tile), lambda i, n_ref: (0, i)),   # student logits
            pl.BlockSpec((c, tile), lambda i, n_ref: (0, i)),   # global (dg) logits
        ],
        out_specs=pl.BlockSpec(memory_space=pltpu.MemorySpace.SMEM),
        scratch_shapes=[pltpu.VMEM((1, tile), jnp.float32)],
    )
    out = pl.pallas_call(
        _ntd_loss_kernel,
        out_shape=jax.ShapeDtypeStruct((1, 1), jnp.float32),
        grid_spec=grid_spec,
        compiler_params=pltpu.CompilerParams(
            dimension_semantics=("arbitrary",),
            vmem_limit_bytes=vmem_limit),
    )(n_arr, tgt, prep(shallow_logits), prep(logits), prep(dg_logits))
    return out[0, 0]


def _reference(shallow_logits, logits, targets, dg_logits):
    """Pure-JAX reference mirroring the PyTorch module (no fancy indexing)."""
    n, c = logits.shape
    oh = jax.nn.one_hot(targets, c, dtype=bool)
    nt = jnp.logical_not(oh)
    neg = jnp.float32(NEG_INF)

    ce = jnp.mean(jax.nn.logsumexp(logits, axis=1)
                  - jnp.sum(jnp.where(oh, logits, 0.0), axis=1))

    def log_softmax_nt(x):
        return jax.nn.log_softmax(jnp.where(nt, x / TAU, neg), axis=1)

    lq = log_softmax_nt(logits)
    ls = log_softmax_nt(shallow_logits)
    lp = log_softmax_nt(dg_logits)
    p = jnp.where(nt, jnp.exp(lp), 0.0)
    kl = lambda logq: jnp.sum(jnp.where(nt, p * (lp - logq), 0.0)) / n
    return ce + BETA * (TAU ** 2) * kl(lq) + 2.0 * kl(ls)


if __name__ == "__main__":
    keys = jax.random.split(jax.random.PRNGKey(0), 8)

    # Small single-tile case.
    N = 8
    shallow = jax.random.normal(keys[0], (N, NUM_CLASSES), dtype=jnp.float32)
    logits = jax.random.normal(keys[1], (N, NUM_CLASSES), dtype=jnp.float32)
    dg = jax.random.normal(keys[2], (N, NUM_CLASSES), dtype=jnp.float32)
    targets = jax.random.randint(keys[3], (N,), 0, NUM_CLASSES, dtype=jnp.int32)

    out = jax.block_until_ready(ntd_loss(shallow, logits, targets, dg))
    ref = jax.block_until_ready(_reference(shallow, logits, targets, dg))
    np.testing.assert_allclose(np.asarray(out), np.asarray(ref),
                               rtol=1e-4, atol=1e-4)

    # Multi-tile case: batch not a multiple of 128, forces grid accumulation,
    # the padded-column mask, and the init/finalize paths.
    N2 = 300
    shallow2 = jax.random.normal(keys[4], (N2, NUM_CLASSES), dtype=jnp.float32)
    logits2 = jax.random.normal(keys[5], (N2, NUM_CLASSES), dtype=jnp.float32)
    dg2 = jax.random.normal(keys[6], (N2, NUM_CLASSES), dtype=jnp.float32)
    targets2 = jax.random.randint(keys[7], (N2,), 0, NUM_CLASSES, dtype=jnp.int32)

    out2 = jax.block_until_ready(
        ntd_loss(shallow2, logits2, targets2, dg2, tile_n=128))
    ref2 = jax.block_until_ready(_reference(shallow2, logits2, targets2, dg2))
    np.testing.assert_allclose(np.asarray(out2), np.asarray(ref2),
                               rtol=1e-4, atol=1e-4)

    print("KERNEL_OK")
</pallas_src>

<mosaic_0001>
module attributes {stable_mosaic.version = 11 : i64} {
  func.func @_ntd_loss_kernel(%arg0: i32, %arg1: memref<1xi32, #tpu.memory_space<smem>>, %arg2: memref<1x128xi32, #tpu.memory_space<vmem>>, %arg3: memref<10x128xf32, #tpu.memory_space<vmem>>, %arg4: memref<10x128xf32, #tpu.memory_space<vmem>>, %arg5: memref<10x128xf32, #tpu.memory_space<vmem>>, %arg6: memref<1x1xf32, #tpu.memory_space<smem>>, %arg7: memref<1x128xf32, #tpu.memory_space<vmem>>) attributes {dimension_semantics = [#tpu.dimension_semantics<arbitrary>], iteration_bounds = array<i64: 1>, scalar_prefetch = 1 : i64, scratch_operands = 1 : i64, tpu.core_type = #tpu.core_type<tc>, window_params = [{transform_indices = @transform_0, window_bounds = array<i64: 1, 128>}, {transform_indices = @transform_1, window_bounds = array<i64: 10, 128>}, {transform_indices = @transform_2, window_bounds = array<i64: 10, 128>}, {transform_indices = @transform_3, window_bounds = array<i64: 10, 128>}, {transform_indices = @transform_4, window_bounds = array<i64: 1, 1>}]} {
    %c0_i32 = arith.constant 0 : i32
    %0 = arith.cmpi eq, %arg0, %c0_i32 : i32
    %1 = arith.extui %0 : i1 to i32
    %c0_i32_0 = arith.constant 0 : i32
    %2 = arith.cmpi ne, %1, %c0_i32_0 : i32
    scf.if %2 {
      %cst_40 = arith.constant 0.000000e+00 : f32
      %108 = vector.broadcast %cst_40 : f32 to vector<1x128xf32>
      %c0_41 = arith.constant 0 : index
      %c0_42 = arith.constant 0 : index
      %109 = vector.load %arg7[%c0_41, %c0_42] : memref<1x128xf32, #tpu.memory_space<vmem>>, vector<1x128xf32>
      tpu.vector_store %arg7[%c0_41, %c0_42], %108 {strides = array<i32>} : memref<1x128xf32, #tpu.memory_space<vmem>>, vector<1x128xf32>,
    } else {
    }
    %c0 = arith.constant 0 : index
    %c0_1 = arith.constant 0 : index
    %3 = vector.load %arg3[%c0, %c0_1] : memref<10x128xf32, #tpu.memory_space<vmem>>, vector<10x128xf32>
    %c0_2 = arith.constant 0 : index
    %c0_3 = arith.constant 0 : index
    %4 = vector.load %arg4[%c0_2, %c0_3] : memref<10x128xf32, #tpu.memory_space<vmem>>, vector<10x128xf32>
    %c0_4 = arith.constant 0 : index
    %c0_5 = arith.constant 0 : index
    %5 = vector.load %arg5[%c0_4, %c0_5] : memref<10x128xf32, #tpu.memory_space<vmem>>, vector<10x128xf32>
    %c0_6 = arith.constant 0 : index
    %c0_7 = arith.constant 0 : index
    %6 = vector.load %arg2[%c0_6, %c0_7] : memref<1x128xi32, #tpu.memory_space<vmem>>, vector<1x128xi32>
    %7 = tpu.iota {dimensions = array<i32: 0>} : vector<10x128xi32>
    %8 = vector.broadcast %6 : vector<1x128xi32> to vector<10x128xi32>
    %9 = arith.cmpi eq, %7, %8 : vector<10x128xi32>
    %cst = arith.constant dense<true> : vector<10x128xi1>
    %10 = arith.xori %9, %cst : vector<10x128xi1>
    %c0_8 = arith.constant 0 : index
    %11 = memref.load %arg1[%c0_8] : memref<1xi32, #tpu.memory_space<smem>>
    %12 = tpu.iota {dimensions = array<i32: 1>} : vector<1x128xi32>
    %c128_i32 = arith.constant 128 : i32
    %13 = arith.muli %arg0, %c128_i32 : i32
    %14 = vector.broadcast %13 : i32 to vector<1x128xi32>
    %15 = arith.addi %12, %14 : vector<1x128xi32>
    %16 = vector.broadcast %11 : i32 to vector<1x128xi32>
    %17 = arith.cmpi slt, %15, %16 : vector<1x128xi32>
    %cst_9 = arith.constant dense<0xFF800000> : vector<128xf32>
    %18 = vector.multi_reduction <maximumf>, %4, %cst_9 [0] : vector<10x128xf32> to vector<128xf32>
    %19 = vector.shape_cast %18 : vector<128xf32> to vector<1x128xf32>
    %20 = vector.broadcast %19 : vector<1x128xf32> to vector<10x128xf32>
    %21 = arith.subf %4, %20 : vector<10x128xf32>
    %22 = math.exp %21 : vector<10x128xf32>
    %cst_10 = arith.constant dense<0.000000e+00> : vector<128xf32>
    %23 = vector.multi_reduction <add>, %22, %cst_10 [0] : vector<10x128xf32> to vector<128xf32>
    %24 = vector.shape_cast %23 : vector<128xf32> to vector<1x128xf32>
    %25 = math.log %24 : vector<1x128xf32>
    %26 = arith.addf %19, %25 : vector<1x128xf32>
    %cst_11 = arith.constant 0.000000e+00 : f32
    %27 = vector.broadcast %cst_11 : f32 to vector<10x128xf32>
    %28 = arith.select %9, %4, %27 : vector<10x128xi1>, vector<10x128xf32>
    %cst_12 = arith.constant dense<0.000000e+00> : vector<128xf32>
    %29 = vector.multi_reduction <add>, %28, %cst_12 [0] : vector<10x128xf32> to vector<128xf32>
    %30 = vector.shape_cast %29 : vector<128xf32> to vector<1x128xf32>
    %31 = arith.subf %26, %30 : vector<1x128xf32>
    %cst_13 = arith.constant 0.333333343 : f32
    %32 = vector.broadcast %cst_13 : f32 to vector<10x128xf32>
    %33 = arith.mulf %4, %32 : vector<10x128xf32>
    %cst_14 = arith.constant -1.000000e+30 : f32
    %34 = vector.broadcast %cst_14 : f32 to vector<10x128xf32>
    %35 = arith.select %10, %33, %34 : vector<10x128xi1>, vector<10x128xf32>
    %cst_15 = arith.constant dense<0xFF800000> : vector<128xf32>
    %36 = vector.multi_reduction <maximumf>, %35, %cst_15 [0] : vector<10x128xf32> to vector<128xf32>
    %37 = vector.shape_cast %36 : vector<128xf32> to vector<1x128xf32>
    %38 = vector.broadcast %37 : vector<1x128xf32> to vector<10x128xf32>
    %39 = arith.subf %33, %38 : vector<10x128xf32>
    %cst_16 = arith.constant -1.000000e+30 : f32
    %40 = vector.broadcast %cst_16 : f32 to vector<10x128xf32>
    %41 = arith.select %10, %39, %40 : vector<10x128xi1>, vector<10x128xf32>
    %42 = math.exp %41 : vector<10x128xf32>
    %cst_17 = arith.constant dense<0.000000e+00> : vector<128xf32>
    %43 = vector.multi_reduction <add>, %42, %cst_17 [0] : vector<10x128xf32> to vector<128xf32>
    %44 = vector.shape_cast %43 : vector<128xf32> to vector<1x128xf32>
    %45 = math.log %44 : vector<1x128xf32>
    %46 = arith.addf %37, %45 : vector<1x128xf32>
    %cst_18 = arith.constant 0.333333343 : f32
    %47 = vector.broadcast %cst_18 : f32 to vector<10x128xf32>
    %48 = arith.mulf %3, %47 : vector<10x128xf32>
    %cst_19 = arith.constant -1.000000e+30 : f32
    %49 = vector.broadcast %cst_19 : f32 to vector<10x128xf32>
    %50 = arith.select %10, %48, %49 : vector<10x128xi1>, vector<10x128xf32>
    %cst_20 = arith.constant dense<0xFF800000> : vector<128xf32>
    %51 = vector.multi_reduction <maximumf>, %50, %cst_20 [0] : vector<10x128xf32> to vector<128xf32>
    %52 = vector.shape_cast %51 : vector<128xf32> to vector<1x128xf32>
    %53 = vector.broadcast %52 : vector<1x128xf32> to vector<10x128xf32>
    %54 = arith.subf %48, %53 : vector<10x128xf32>
    %cst_21 = arith.constant -1.000000e+30 : f32
    %55 = vector.broadcast %cst_21 : f32 to vector<10x128xf32>
    %56 = arith.select %10, %54, %55 : vector<10x128xi1>, vector<10x128xf32>
    %57 = math.exp %56 : vector<10x128xf32>
    %cst_22 = arith.constant dense<0.000000e+00> : vector<128xf32>
    %58 = vector.multi_reduction <add>, %57, %cst_22 [0] : vector<10x128xf32> to vector<128xf32>
    %59 = vector.shape_cast %58 : vector<128xf32> to vector<1x128xf32>
    %60 = math.log %59 : vector<1x128xf32>
    %61 = arith.addf %52, %60 : vector<1x128xf32>
    %cst_23 = arith.constant 0.333333343 : f32
    %62 = vector.broadcast %cst_23 : f32 to vector<10x128xf32>
    %63 = arith.mulf %5, %62 : vector<10x128xf32>
    %cst_24 = arith.constant -1.000000e+30 : f32
    %64 = vector.broadcast %cst_24 : f32 to vector<10x128xf32>
    %65 = arith.select %10, %63, %64 : vector<10x128xi1>, vector<10x128xf32>
    %cst_25 = arith.constant dense<0xFF800000> : vector<128xf32>
    %66 = vector.multi_reduction <maximumf>, %65, %cst_25 [0] : vector<10x128xf32> to vector<128xf32>
    %67 = vector.shape_cast %66 : vector<128xf32> to vector<1x128xf32>
    %68 = vector.broadcast %67 : vector<1x128xf32> to vector<10x128xf32>
    %69 = arith.subf %63, %68 : vector<10x128xf32>
    %cst_26 = arith.constant -1.000000e+30 : f32
    %70 = vector.broadcast %cst_26 : f32 to vector<10x128xf32>
    %71 = arith.select %10, %69, %70 : vector<10x128xi1>, vector<10x128xf32>
    %72 = math.exp %71 : vector<10x128xf32>
    %cst_27 = arith.constant dense<0.000000e+00> : vector<128xf32>
    %73 = vector.multi_reduction <add>, %72, %cst_27 [0] : vector<10x128xf32> to vector<128xf32>
    %74 = vector.shape_cast %73 : vector<128xf32> to vector<1x128xf32>
    %75 = math.log %74 : vector<1x128xf32>
    %76 = arith.addf %67, %75 : vector<1x128xf32>
    %77 = tpu.reciprocal %74 : vector<1x128xf32> -> vector<1x128xf32>
    %78 = vector.broadcast %77 : vector<1x128xf32> to vector<10x128xf32>
    %79 = arith.mulf %72, %78 : vector<10x128xf32>
    %80 = arith.mulf %79, %63 : vector<10x128xf32>
    %cst_28 = arith.constant dense<0.000000e+00> : vector<128xf32>
    %81 = vector.multi_reduction <add>, %80, %cst_28 [0] : vector<10x128xf32> to vector<128xf32>
    %82 = vector.shape_cast %81 : vector<128xf32> to vector<1x128xf32>
    %83 = arith.mulf %79, %33 : vector<10x128xf32>
    %cst_29 = arith.constant dense<0.000000e+00> : vector<128xf32>
    %84 = vector.multi_reduction <add>, %83, %cst_29 [0] : vector<10x128xf32> to vector<128xf32>
    %85 = vector.shape_cast %84 : vector<128xf32> to vector<1x128xf32>
    %86 = arith.mulf %79, %48 : vector<10x128xf32>
    %cst_30 = arith.constant dense<0.000000e+00> : vector<128xf32>
    %87 = vector.multi_reduction <add>, %86, %cst_30 [0] : vector<10x128xf32> to vector<128xf32>
    %88 = vector.shape_cast %87 : vector<128xf32> to vector<1x128xf32>
    %89 = arith.subf %82, %76 : vector<1x128xf32>
    %90 = arith.subf %89, %85 : vector<1x128xf32>
    %91 = arith.addf %90, %46 : vector<1x128xf32>
    %92 = arith.subf %89, %88 : vector<1x128xf32>
    %93 = arith.addf %92, %61 : vector<1x128xf32>
    %cst_31 = arith.constant 9.000000e+00 : f32
    %94 = vector.broadcast %cst_31 : f32 to vector<1x128xf32>
    %95 = arith.mulf %94, %91 : vector<1x128xf32>
    %96 = arith.addf %31, %95 : vector<1x128xf32>
    %cst_32 = arith.constant 2.000000e+00 : f32
    %97 = vector.broadcast %cst_32 : f32 to vector<1x128xf32>
    %98 = arith.mulf %97, %93 : vector<1x128xf32>
    %99 = arith.addf %96, %98 : vector<1x128xf32>
    %cst_33 = arith.constant 0.000000e+00 : f32
    %100 = vector.broadcast %cst_33 : f32 to vector<1x128xf32>
    %101 = arith.select %17, %99, %100 : vector<1x128xi1>, vector<1x128xf32>
    %c0_34 = arith.constant 0 : index
    %c0_35 = arith.constant 0 : index
    %102 = vector.load %arg7[%c0_34, %c0_35] : memref<1x128xf32, #tpu.memory_space<vmem>>, vector<1x128xf32>
    %103 = arith.addf %102, %101 : vector<1x128xf32>
    %c0_36 = arith.constant 0 : index
    %c0_37 = arith.constant 0 : index
    %104 = vector.load %arg7[%c0_36, %c0_37] : memref<1x128xf32, #tpu.memory_space<vmem>>, vector<1x128xf32>
    tpu.vector_store %arg7[%c0_36, %c0_37], %103 {strides = array<i32>} : memref<1x128xf32, #tpu.memory_space<vmem>>, vector<1x128xf32>,
    %c0_i32_38 = arith.constant 0 : i32
    %105 = arith.cmpi eq, %arg0, %c0_i32_38 : i32
    %106 = arith.extui %105 : i1 to i32
    %c0_i32_39 = arith.constant 0 : i32
    %107 = arith.cmpi ne, %106, %c0_i32_39 : i32
    scf.if %107 {
      %c0_40 = arith.constant 0 : index
      %c0_41 = arith.constant 0 : index
      %108 = vector.load %arg7[%c0_40, %c0_41] : memref<1x128xf32, #tpu.memory_space<vmem>>, vector<1x128xf32>
      %109 = vector.shape_cast %108 : vector<1x128xf32> to vector<1x1x128xf32>
      %cst_42 = arith.constant dense<0.000000e+00> : vector<1xf32>
      %110 = vector.multi_reduction <add>, %109, %cst_42 [1, 2] : vector<1x1x128xf32> to vector<1xf32>
      %111 = vector.shape_cast %110 : vector<1xf32> to vector<1x1x1xf32>
      %112 = vector.extract %111[0, 0, 0] : f32 from vector<1x1x1xf32>
      %113 = arith.sitofp %11 : i32 to f32
      %114 = arith.divf %112, %113 : f32
      %c0_43 = arith.constant 0 : index
      %c0_44 = arith.constant 0 : index
      %115 = memref.load %arg6[%c0_43, %c0_44] : memref<1x1xf32, #tpu.memory_space<smem>>
      memref.store %114, %arg6[%c0_43, %c0_44] : memref<1x1xf32, #tpu.memory_space<smem>>
    } else {
    }
    return
  }
  func.func @transform_0(%arg0: i32, %arg1: memref<1xi32, #tpu.memory_space<smem>>) -> (i32, i32) {
    %c0_i32 = arith.constant 0 : i32
    %c0_i32_0 = arith.constant 0 : i32
    return %c0_i32, %arg0 : i32, i32
  }
  func.func @transform_1(%arg0: i32, %arg1: memref<1xi32, #tpu.memory_space<smem>>) -> (i32, i32) {
    %c0_i32 = arith.constant 0 : i32
    %c0_i32_0 = arith.constant 0 : i32
    return %c0_i32, %arg0 : i32, i32
  }
  func.func @transform_2(%arg0: i32, %arg1: memref<1xi32, #tpu.memory_space<smem>>) -> (i32, i32) {
    %c0_i32 = arith.constant 0 : i32
    %c0_i32_0 = arith.constant 0 : i32
    return %c0_i32, %arg0 : i32, i32
  }
  func.func @transform_3(%arg0: i32, %arg1: memref<1xi32, #tpu.memory_space<smem>>) -> (i32, i32) {
    %c0_i32 = arith.constant 0 : i32
    %c0_i32_0 = arith.constant 0 : i32
    return %c0_i32, %arg0 : i32, i32
  }
  func.func @transform_4(%arg0: i32, %arg1: memref<1xi32, #tpu.memory_space<smem>>) -> (i32, i32) {
    %c0_i32 = arith.constant 0 : i32
    %c0_i32_0 = arith.constant 0 : i32
    %c0_i32_1 = arith.constant 0 : i32
    return %c0_i32, %c0_i32_0 : i32, i32
  }
}

</mosaic_0001>

<bundles_post_ra>
// kernel: tpu_custom_call.1
= control target key start
LH: loop header
LB: loop body
LE: loop exit
PB: predicated region body
PF: predicated region fallthrough
CT: control target
= control target key end

     0   :  { %11 = vsyncpa [#allocation6], 0  ;;  %s645_s0 = inlined_call_operand.<no memory space> [shape: s32[1], index: 0, kind: input, shape index: {}]   ;;  %s646_s1 = inlined_call_operand.vmem [shape: s32[1,128], index: 1, kind: input, shape index: {}]   ;;  %s647_s2 = inlined_call_operand.hbm [shape: f32[10,128], index: 2, kind: input, shape index: {}]   ;;  %s648_s3 = inlined_call_operand.hbm [shape: f32[10,128], index: 3, kind: input, shape index: {}]   ;;  %s649_s4 = inlined_call_operand.hbm [shape: f32[10,128], index: 4, kind: input, shape index: {}]   ;;  %s650_s5 = inlined_call_operand.hbm [shape: f32[1,1], index: 5, kind: output, shape index: {}]  }
   0x1   :  { %12 = vsyncpa [#allocation9], 0 }
   0x2   :  { %13 = vsyncpa [#allocation7], 0  ;;  %s428_s18 = smov [#allocation8]   ;;  %s429_s20 = smov [#allocation5]  }
   0x3   :  { %s33_s19 = sshll.u32 %s428_s18, 4  ;;  %s21_s21 = sshll.u32 %s429_s20, 4  ;;  %s34_s19 = int_to_ptr.vmem [resolvable:$true] %s33_s19  ;;  %s466_s21 = int_to_ptr.vmem [resolvable:$true] %s21_s21 }
   0x4   :  { %s346_s24 = scalar_lea.hbm %s648_s3, 256 }
   0x5   :  { %p347_p0 = scmp.ne.s32.totalorder %s648_s3, %s346_s24  ;;  %p350_p1 = scmp.lt.u32.totalorder %s346_s24, %s648_s3 }
   0x7   :  { %p352_p2 = pnand %p350_p1, %p347_p0 }
   0x9   :  { %355 = shalt.err (!%p352_p2)
}
   0xa   :  { %s356_s29 = scalar_lea.vmem %s34_s19, 256  ;;  %p361_p4 = scmp.lt.s32.totalorder %s34_s19, %s34_s19 }
   0xb   :  { %p357_p3 = scmp.ne.s32.totalorder %s34_s19, %s356_s29  ;;  %p362_p5 = scmp.lt.s32.totalorder %s356_s29, %s356_s29 }
   0xd   :  { %p363_p6 = por %p362_p5, %p361_p4 }
   0xf   :  { %p364_p7 = pnand %p363_p6, %p357_p3 }
  0x11   :  { %367 = shalt.err (!%p364_p7)
}
  0x12   :  { %s430_s30 = smov 128   ;;  %s431_s6 = smov 8  }
  0x13   :  { %39 = dma.hbm_to_vmem [thread:$0]  %s648_s3, 256, %s34_s19, [#allocation9], %s430_s30, %s430_s30, %s431_s6  }
  0x14   :  { %s368_s11 = scalar_lea.hbm %s647_s2, 256 }
  0x15   :  { %p369_p8 = scmp.ne.s32.totalorder %s647_s2, %s368_s11  ;;  %p372_p9 = scmp.lt.u32.totalorder %s368_s11, %s647_s2 }
  0x17   :  { %p374_p10 = pnand %p372_p9, %p369_p8 }
  0x19   :  { %377 = shalt.err (!%p374_p10)
}
  0x1a   :  { %s378_s16 = scalar_lea.vmem %s466_s21, 256  ;;  %p383_p12 = scmp.lt.s32.totalorder %s466_s21, %s466_s21 }
  0x1b   :  { %p379_p11 = scmp.ne.s32.totalorder %s466_s21, %s378_s16  ;;  %p384_p13 = scmp.lt.s32.totalorder %s378_s16, %s378_s16 }
  0x1d   :  { %p385_p0 = por %p384_p13, %p383_p12 }
  0x1f   :  { %p386_p1 = pnand %p385_p0, %p379_p11 }
  0x21   :  { %389 = shalt.err (!%p386_p1)
}
  0x22   :  { %27 = dma.hbm_to_vmem [thread:$0]  %s647_s2, 256, %s466_s21, [#allocation6], %s430_s30, %s430_s30, %s431_s6  }
  0x23   :  { %s432_s18 = smov [#allocation10]   ;;  %s390_s23 = scalar_lea.hbm %s649_s4, 256 }
  0x24   :  { %s45_s19 = sshll.u32 %s432_s18, 4  ;;  %p391_p2 = scmp.ne.s32.totalorder %s649_s4, %s390_s23  ;;  %s46_s19 = int_to_ptr.vmem [resolvable:$true] %s45_s19 }
  0x25   :  { %p394_p3 = scmp.lt.u32.totalorder %s390_s23, %s649_s4 }
  0x27   :  { %p396_p4 = pnand %p394_p3, %p391_p2 }
  0x29   :  { %399 = shalt.err (!%p396_p4)
}
  0x2a   :  { %s400_s28 = scalar_lea.vmem %s46_s19, 256  ;;  %p405_p6 = scmp.lt.s32.totalorder %s46_s19, %s46_s19 }
  0x2b   :  { %p401_p5 = scmp.ne.s32.totalorder %s46_s19, %s400_s28  ;;  %p406_p7 = scmp.lt.s32.totalorder %s400_s28, %s400_s28 }
  0x2d   :  { %p407_p8 = por %p406_p7, %p405_p6 }
  0x2f   :  { %p408_p9 = pnand %p407_p8, %p401_p5 }
  0x31   :  { %411 = shalt.err (!%p408_p9)
}
  0x32   :  { %51 = dma.hbm_to_vmem [thread:$0]  %s649_s4, 256, %s46_s19, [#allocation9], %s430_s30, %s430_s30, %s431_s6  }
  0x33   :  { %422 = dma.done.wait [#allocation6], 256  }
  0x34   :  { %423 = vsyncadd [#allocation6], 4294967040 }
  0x35   :  { %424 = dma.done.wait [#allocation9], 512  }
  0x36   :  { %425 = vsyncadd [#allocation9], 4294966784  ;;  %v73_v0 = vlaneseq  ;;  %v433_v1 = vmov 0.0   ;;  %v519_v4 = vld [vmem:[#allocation8] sm:$0xff]  ;;  %v66_v5 = vld [vmem:[#allocation5] sm:$0xff]  ;;  %vm92_vm0 = vcmask 1041408   ;;  %s283_s8 = scvt.s32.f32 %s645_s0 }
  0x37   :  { %65 = vst [vmem:[#allocation2] sm:$0x1] %v433_v1  ;;  %v67_v6 = vld [vmem:[#allocation5 + $0x8] sm:$0x3]  ;;  %v69_v7 = vld [vmem:[#allocation8 + $0x8] sm:$0x3] }
  0x38   :  { %v74_v2 = vshrl.u32 %v73_v0, 7  ;;  %v70_v8 = vld [vmem:[#allocation10] sm:$0xff]  ;;  %v305_v9 = vld [vmem:[%s646_s1] ss:$0 sm:$0xff]  ;;  %v93_v10 = vsel %vm92_vm0, %v69_v7, -inf  ;;  %vm434_vm3 = vmmov 1  }
  0x39   :  { %v526_v11 = vmul.f32 0.33333334, %v519_v4  ;;  %v71_v12 = vld [vmem:[#allocation10 + $0x8] sm:$0x3]  ;;  %v94_v13 = vmax.f32 %v519_v4, %v93_v10  ;;  %v529_v14 = vmul.f32 0.33333334, %v69_v7 }
  0x3a   :  { %v75_v3 = vadd.s32 8, %v74_v2  ;;  %vm80_vm1 = vcmp.eq.s32.totalorder %v74_v2, %v305_v9  ;;  %v536_v18 = vmul.f32 0.33333334, %v66_v5  ;;  %v538_v19 = vmul.f32 0.33333334, %v67_v6 }
  0x3b   :  { %vm531_vm4 = vmxor %vm80_vm1, %vm434_vm3  ;;  %v118_v16 = vsel %vm80_vm1, %v519_v4, 0.0  ;;  %v95_v21 = vrot.slane %v94_v13, 4  ;;  %v548_v24 = vmul.f32 0.33333334, %v70_v8  ;;  %v563_v32 = vmul.f32 0.33333334, %v71_v12 }
  0x3c   :  { %vm81_vm2 = vcmp.eq.s32.totalorder %v75_v3, %v305_v9  ;;  %v131_v23 = vsel %vm531_vm4, %v526_v11, -1e+30  ;;  %v162_v27 = vsel %vm531_vm4, %v536_v18, -1e+30  ;;  %vm272_vm7 = vcmask 1040384  }
  0x3d   :  { %v119_v17 = vsel %vm81_vm2, %v69_v7, 0.0  ;;  %vm540_vm5 = vmxor %vm81_vm2, %vm434_vm3  ;;  %v96_v29 = vmax.f32 %v94_v13, %v95_v21  ;;  %v193_v35 = vsel %vm531_vm4, %v548_v24, -1e+30 }
  0x3e   :  { %v120_v22 = vsel %vm92_vm0, %v119_v17, 0.0  ;;  %v132_v26 = vsel %vm540_vm5, %v529_v14, -1e+30  ;;  %v163_v28 = vsel %vm540_vm5, %v538_v19, -1e+30 }
  0x3f   :  { %v550_v25 = vadd.f32 %v120_v22, %v118_v16  ;;  %v133_v30 = vsel %vm92_vm0, %v132_v26, -inf  ;;  %v164_v31 = vsel %vm92_vm0, %v163_v28, -inf  ;;  %v97_v36 = vrot.slane %v96_v29, 2 }
  0x40   :  { %v134_v33 = vmax.f32 %v131_v23, %v133_v30  ;;  %v165_v34 = vmax.f32 %v162_v27, %v164_v31  ;;  %v194_v37 = vsel %vm540_vm5, %v563_v32, -1e+30 }
  0x41   :  { %v195_v40 = vsel %vm92_vm0, %v194_v37, -inf  ;;  %v98_v41 = vmax.f32 %v96_v29, %v97_v36 }
  0x42   :  { %v135_v38 = vrot.slane %v134_v33, 4  ;;  %v166_v39 = vrot.slane %v165_v34, 4  ;;  %v196_v42 = vmax.f32 %v193_v35, %v195_v40 }
  0x43   :  { %v99_v45 = vrot.slane %v98_v41, 1 }
  0x44   :  { %v136_v43 = vmax.f32 %v134_v33, %v135_v38  ;;  %v167_v44 = vmax.f32 %v165_v34, %v166_v39  ;;  %v197_v46 = vrot.slane %v196_v42, 4 }
  0x45   :  { %v572_v49 = vmax.f32 %v98_v41, %v99_v45 }
  0x46   :  { %v137_v47 = vrot.slane %v136_v43, 2  ;;  %v168_v48 = vrot.slane %v167_v44, 2  ;;  %v198_v50 = vmax.f32 %v196_v42, %v197_v46 }
  0x47   :  { %v102_v53 = vsub.f32 %v69_v7, %v572_v49  ;;  %v101_v55 = vsub.f32 %v519_v4, %v572_v49 }
  0x48   :  { %v138_v51 = vmax.f32 %v136_v43, %v137_v47  ;;  %v169_v52 = vmax.f32 %v167_v44, %v168_v48  ;;  %v199_v54 = vrot.slane %v198_v50, 2 }
  0x49   :  { %v105_v59 = vmul.f32 1.442695, %v102_v53  ;;  %v103_v63 = vmul.f32 1.442695, %v101_v55 }
  0x4a   :  { %v139_v56 = vrot.slane %v138_v51, 1  ;;  %v170_v57 = vrot.slane %v169_v52, 1  ;;  %v200_v58 = vmax.f32 %v198_v50, %v199_v54 }
  0x4b   :  { %318 = vpow2.f32 %v105_v59 }
  0x4c   :  { %v577_v60 = vmax.f32 %v138_v51, %v139_v56  ;;  %v579_v61 = vmax.f32 %v169_v52, %v170_v57  ;;  %v201_v62 = vrot.slane %v200_v58, 1  ;;  %320 = vpow2.f32 %v103_v63 }
  0x4e   :  { %v141_v1 = vsub.f32 %v526_v11, %v577_v60  ;;  %v142_v2 = vsub.f32 %v529_v14, %v577_v60  ;;  %v172_v3 = vsub.f32 %v536_v18, %v579_v61  ;;  %v173_v4 = vsub.f32 %v538_v19, %v579_v61 }
  0x4f   :  { %v589_v5 = vmax.f32 %v200_v58, %v201_v62 }
  0x50   :  { %v143_v6 = vsel %vm531_vm4, %v141_v1, -1e+30  ;;  %v144_v7 = vsel %vm540_vm5, %v142_v2, -1e+30  ;;  %v174_v8 = vsel %vm531_vm4, %v172_v3, -1e+30 }
  0x51   :  { %v145_v9 = vmul.f32 1.442695, %v143_v6  ;;  %v147_v10 = vmul.f32 1.442695, %v144_v7  ;;  %v175_v12 = vsel %vm540_vm5, %v173_v4, -1e+30  ;;  %v203_v13 = vsub.f32 %v548_v24, %v589_v5 }
  0x52   :  { %v176_v16 = vmul.f32 1.442695, %v174_v8  ;;  %v178_v17 = vmul.f32 1.442695, %v175_v12  ;;  %v204_v21 = vsub.f32 %v563_v32, %v589_v5  ;;  %v122_v7 = vrot.slane %v550_v25, 4 }
  0x53   :  { %322 = vpow2.f32 %v145_v9  ;;  %v205_v22 = vsel %vm531_vm4, %v203_v13, -1e+30 }
  0x54   :  { %324 = vpow2.f32 %v147_v10  ;;  %v206_v23 = vsel %vm540_vm5, %v204_v21, -1e+30  ;;  %v207_v26 = vmul.f32 1.442695, %v205_v22  ;;  %v123_v13 = vadd.f32 %v122_v7, %v550_v25 }
  0x55   :  { %326 = vpow2.f32 %v176_v16  ;;  %v209_v27 = vmul.f32 1.442695, %v206_v23  ;;  %v319_v28 = vpop.eup %318 }
  0x56   :  { %328 = vpow2.f32 %v178_v17  ;;  %v321_v29 = vpop.eup %320  ;;  %v107_v33 = vsel %vm92_vm0, %v319_v28, 0.0 }
  0x57   :  { %330 = vpow2.f32 %v207_v26  ;;  %v108_v37 = vadd.f32 %v321_v29, %v107_v33 }
  0x58   :  { %332 = vpow2.f32 %v209_v27 }
  0x59   :  { %v109_v43 = vrot.slane %v108_v37, 4 }
  0x5b   :  { %v110_v48 = vadd.f32 %v109_v43, %v108_v37 }
  0x5d   :  { %v323_v30 = vpop.eup %322  ;;  %v111_v54 = vrot.slane %v110_v48, 2 }
  0x5e   :  { %v325_v31 = vpop.eup %324 }
  0x5f   :  { %v327_v34 = vpop.eup %326  ;;  %v149_v15 = vsel %vm92_vm0, %v325_v31, 0.0  ;;  %v112_v59 = vadd.f32 %v111_v54, %v110_v48  ;;  %v124_v31 = vrot.slane %v123_v13, 2 }
  0x60   :  { %v329_v35 = vpop.eup %328  ;;  %v150_v39 = vadd.f32 %v323_v30, %v149_v15 }
  0x61   :  { %v331_v36 = vpop.eup %330  ;;  %v180_v20 = vsel %vm92_vm0, %v329_v35, 0.0  ;;  %v113_v1 = vrot.slane %v112_v59, 1 }
  0x62   :  { %v333_v38 = vpop.eup %332  ;;  %v181_v40 = vadd.f32 %v327_v34, %v180_v20  ;;  %v151_v44 = vrot.slane %v150_v39, 4 }
  0x63   :  { %v211_v41 = vsel %vm92_vm0, %v333_v38, 0.0  ;;  %v114_v4 = vadd.f32 %v113_v1, %v112_v59 }
  0x64   :  { %v212_v42 = vadd.f32 %v331_v36, %v211_v41  ;;  %v182_v46 = vrot.slane %v181_v40, 4  ;;  %v152_v50 = vadd.f32 %v151_v44, %v150_v39 }
  0x66   :  { %v213_v45 = vrot.slane %v212_v42, 4  ;;  %v183_v52 = vadd.f32 %v182_v46, %v181_v40  ;;  %v153_v55 = vrot.slane %v152_v50, 2 }
  0x68   :  { %v214_v47 = vadd.f32 %v213_v45, %v212_v42  ;;  %v184_v57 = vrot.slane %v183_v52, 2  ;;  %v154_v62 = vadd.f32 %v153_v55, %v152_v50 }
  0x6a   :  { %v215_v51 = vrot.slane %v214_v47, 2  ;;  %v185_v63 = vadd.f32 %v184_v57, %v183_v52  ;;  %v155_v2 = vrot.slane %v154_v62, 1 }
  0x6c   :  { %v216_v53 = vadd.f32 %v215_v51, %v214_v47  ;;  %v186_v3 = vrot.slane %v185_v63, 1  ;;  %v156_v6 = vadd.f32 %v155_v2, %v154_v62 }
  0x6e   :  { %v217_v56 = vrot.slane %v216_v53, 1  ;;  %v187_v8 = vadd.f32 %v186_v3, %v185_v63 }
  0x70   :  { %v218_v58 = vadd.f32 %v217_v56, %v216_v53 }
  0x72   :  { %334 = vrcp.f32 %v218_v58 }
  0x73   :  { %336 = vlog2.f32 %v218_v58 }
  0x74   :  { %338 = vlog2.f32 %v114_v4 }
  0x75   :  { %340 = vlog2.f32 %v156_v6  ;;  %v90_v6 = vstv %s645_s0  ;;  %s412_s0 = scalar_lea.hbm %s650_s5, 16 }
  0x76   :  { %342 = vlog2.f32 %v187_v8  ;;  %p413_p10 = scmp.ne.s32.totalorder %s650_s5, %s412_s0  ;;  %p416_p11 = scmp.lt.u32.totalorder %s412_s0, %s650_s5 }
  0x78   :  { %p418_p12 = pnand %p416_p11, %p413_p10 }
  0x7c   :  { %v335_v9 = vpop.eup %334 }
  0x7d   :  { %v223_v10 = vmul.f32 %v335_v9, %v331_v36  ;;  %v224_v12 = vmul.f32 %v335_v9, %v333_v38  ;;  %v337_v34 = vpop.eup %336  ;;  %v125_v36 = vadd.f32 %v124_v31, %v123_v13 }
  0x7e   :  { %v339_v15 = vpop.eup %338  ;;  %v220_v20 = vmul.f32 0.6931472, %v337_v34 }
  0x7f   :  { %v225_v16 = vmul.f32 %v223_v10, %v548_v24  ;;  %v226_v17 = vmul.f32 %v224_v12, %v563_v32  ;;  %v235_v21 = vmul.f32 %v223_v10, %v526_v11  ;;  %v236_v22 = vmul.f32 %v224_v12, %v529_v14 }
  0x80   :  { %v245_v23 = vmul.f32 %v223_v10, %v536_v18  ;;  %v246_v26 = vmul.f32 %v224_v12, %v538_v19  ;;  %v341_v18 = vpop.eup %340  ;;  %v116_v43 = vmul.f32 0.6931472, %v339_v15  ;;  %v126_v44 = vrot.slane %v125_v36, 1 }
  0x81   :  { %v227_v27 = vsel %vm92_vm0, %v226_v17, 0.0  ;;  %v237_v28 = vsel %vm92_vm0, %v236_v22, 0.0  ;;  %v343_v37 = vpop.eup %342  ;;  %v158_v45 = vmul.f32 0.6931472, %v341_v18  ;;  %v221_v48 = vadd.f32 %v220_v20, %v589_v5 }
  0x82   :  { %v228_v29 = vadd.f32 %v227_v27, %v225_v16  ;;  %v238_v30 = vadd.f32 %v237_v28, %v235_v21  ;;  %v247_v25 = vsel %vm92_vm0, %v246_v26, 0.0  ;;  %v189_v47 = vmul.f32 0.6931472, %v343_v37 }
  0x83   :  { %v248_v24 = vadd.f32 %v247_v25, %v245_v23  ;;  %v127_v55 = vadd.f32 %v126_v44, %v125_v36  ;;  %v117_v57 = vadd.f32 %v116_v43, %v572_v49  ;;  %v159_v58 = vadd.f32 %v158_v45, %v577_v60  ;;  %v265_v60 = vld [vmem:[#allocation2] sm:$0x1] }
  0x84   :  { %v229_v33 = vrot.slane %v228_v29, 4  ;;  %v239_v32 = vrot.slane %v238_v30, 4  ;;  %v190_v59 = vadd.f32 %v189_v47, %v579_v61  ;;  %v86_v5 = vand.u32 127, %v73_v0 }
  0x85   :  { %v249_v11 = vrot.slane %v248_v24, 4  ;;  %v128_v2 = vsub.f32 %v117_v57, %v127_v55  ;;  %v284_v0 = vstv %s283_s8 }
  0x86   :  { %v230_v14 = vadd.f32 %v229_v33, %v228_v29  ;;  %v240_v35 = vadd.f32 %v239_v32, %v238_v30  ;;  %vm91_vm6 = vcmp.lt.s32.totalorder %v86_v5, %v90_v6  ;;  %344 = vrcp.f32 %v284_v0 }
  0x87   :  { %v250_v19 = vadd.f32 %v249_v11, %v248_v24 }
  0x88   :  { %v231_v38 = vrot.slane %v230_v14, 2  ;;  %v241_v39 = vrot.slane %v240_v35, 2 }
  0x89   :  { %v251_v40 = vrot.slane %v250_v19, 2 }
  0x8a   :  { %v232_v41 = vadd.f32 %v231_v38, %v230_v14  ;;  %v242_v42 = vadd.f32 %v241_v39, %v240_v35 }
  0x8b   :  { %v252_v46 = vadd.f32 %v251_v40, %v250_v19 }
  0x8c   :  { %v233_v50 = vrot.slane %v232_v41, 1  ;;  %v243_v51 = vrot.slane %v242_v42, 1 }
  0x8d   :  { %v253_v52 = vrot.slane %v252_v46, 1 }
  0x8e   :  { %v234_v53 = vadd.f32 %v233_v50, %v232_v41  ;;  %v244_v54 = vadd.f32 %v243_v51, %v242_v42 }
  0x8f   :  { %v254_v56 = vadd.f32 %v253_v52, %v252_v46 }
  0x90   :  { %v255_v62 = vsub.f32 %v234_v53, %v221_v48  ;;  %v345_v27 = vpop.eup %344 }
  0x92   :  { %v256_v63 = vsub.f32 %v255_v62, %v244_v54  ;;  %v258_v1 = vsub.f32 %v255_v62, %v254_v56 }
  0x94   :  { %v257_v3 = vadd.f32 %v256_v63, %v159_v58  ;;  %v259_v4 = vadd.f32 %v258_v1, %v190_v59 }
  0x96   :  { %v260_v7 = vmul.f32 9.0, %v257_v3  ;;  %v262_v8 = vmul.f32 2.0, %v259_v4 }
  0x98   :  { %v261_v9 = vadd.f32 %v260_v7, %v128_v2 }
  0x9a   :  { %v263_v49 = vadd.f32 %v262_v8, %v261_v9 }
  0x9c   :  { %v264_v10 = vsel %vm91_vm6, %v263_v49, 0.0 }
  0x9d   :  { %v266_v61 = vadd.f32 %v265_v60, %v264_v10 }
  0x9f   :  { %267 = vst [vmem:[#allocation2] sm:$0x1] %v266_v61 }
  0xa6   :  { %v271_v12 = vld [vmem:[#allocation2] sm:$0x1] }
  0xa7   :  { %v273_v13 = vsel %vm272_vm7, %v271_v12, 0.0 }
  0xa8   :  { %274 = vadd.xlane.f32.xlu0 %v273_v13 }
 0x135   :  { %v275_v16 = vpop.xlane.xlu0 %274 }
 0x136   :  { %v276_v17 = vrot.slane %v275_v16, 4 }
 0x138   :  { %v277_v21 = vadd.f32 %v276_v17, %v275_v16 }
 0x13a   :  { %v278_v22 = vrot.slane %v277_v21, 2 }
 0x13c   :  { %v279_v23 = vadd.f32 %v278_v22, %v277_v21 }
 0x13e   :  { %v280_v26 = vrot.slane %v279_v23, 1 }
 0x140   :  { %v281_v28 = vadd.f32 %v280_v26, %v279_v23 }
 0x142   :  { %306 = vpush %v281_v28 }
 0x143   :  { %308 = vpush %v345_v27 }
 0x173   :  { %s307_s9 = spop %306 }
 0x174   :  { %s309_s10 = spop %308 }
 0x175   :  { %s287_s11 = smul.f32 %s309_s10, %s307_s9 }
 0x177   :  { %289 = sst [smem:[#allocation11]] %s287_s11 }
 0x178   :  { %421 = shalt.err (!%p418_p12)
}
 0x179   :  { %s435_s17 = smov [#allocation11]  }
 0x17a   :  { %297 = dma.smem_to_hbm %s435_s17, 16, %s650_s5, [#allocation7]  }
 0x17b   :  { %426 = dma.done.wait [#allocation7], 16  }
 0x17c   :  { %427 = vsyncadd [#allocation7], 4294967280 }
 0x17d   :  { %301 = sfence }
 0x17e   :  { %302 = vsyncpa [#allocation6], 1 }
 0x17f   :  { %303 = vsyncpa [#allocation9], 1 }
 0x180   :  { %304 = vsyncpa [#allocation7], 1 }

</bundles_post_ra>
